<compile_context>
chip_gen: v7x
topology: tpu7x:2x2x1
jax: 0.10.0
libtpu: 0.0.40
codegen_flags: <defaults>
</compile_context>

<pallas_src>
import jax
import jax.numpy as jnp
from jax import lax
from jax.experimental import pallas as pl
from jax.experimental.pallas import tpu as pltpu

BN_EPS = 1e-5

# Column layout of the packed (H, 9) f32 parameter slab.
_B1, _B2, _G2, _BE2, _B3, _G3, _BE3, _B4, _WADV = range(9)


def _bn_train_t(h, gamma_col, beta_col):
    """BatchNorm1d (training mode, biased batch stats) on transposed (H, B) acts.

    Batch is the lane dim, so the stats are lane reductions with keepdims; the
    scale/shift form leaves only two full-width (H, B) VPU ops.
    """
    mu = jnp.mean(h, axis=1, keepdims=True)                  # (H, 1)
    d = h - mu
    var = jnp.mean(d * d, axis=1, keepdims=True)             # (H, 1)
    scale = gamma_col * lax.rsqrt(var + BN_EPS)
    shift = beta_col - mu * scale
    return h * scale + shift


def discriminator_kernel(
    yt_ref, xt_ref,       # (OUT, B), (IN, B) f32 activations (transposed)
    w1_ref,               # (H, IN+OUT) bf16 = W1^T
    wstack_ref,           # (3H, H)     bf16 = [W2^T; W3^T; W4^T]
    vec_ref,              # (H, 9) f32: b1, b2, g2, be2, b3, g3, be3, b4, w_adv
    badv_ref,             # SMEM (1,) f32: head bias
    out_ref,              # (1, B) f32 validity (lane-dense)
    cat_ref,              # VMEM scratch (IN+OUT, B) f32: fused-concat staging
):
    n_y = yt_ref.shape[0]
    n_cat = cat_ref.shape[0]
    H = wstack_ref.shape[1]

    def col(i):
        return vec_ref[:, i:i + 1]                           # (H, 1) f32

    def dense(w_bf16, act_f32):
        # bf16 MXU operands, f32 accumulation; elementwise math stays in f32.
        return jnp.dot(w_bf16, act_f32.astype(jnp.bfloat16),
                       preferred_element_type=jnp.float32)

    # Fused concat: stage [y; x] feature-major in VMEM, then ONE layer-1 matmul.
    cat_ref[0:n_y, :] = yt_ref[...]
    cat_ref[n_y:n_cat, :] = xt_ref[...]

    # Layer 1: Linear -> ReLU
    h = jnp.maximum(dense(w1_ref[...], cat_ref[...]) + col(_B1), 0.0)

    # Layer 2: Linear -> ReLU -> BatchNorm1d (training-mode batch stats)
    h = jnp.maximum(dense(wstack_ref[0:H, :], h) + col(_B2), 0.0)
    h = _bn_train_t(h, col(_G2), col(_BE2))

    # Layer 3: Linear -> ReLU -> BatchNorm1d
    h = jnp.maximum(dense(wstack_ref[H:2 * H, :], h) + col(_B3), 0.0)
    h = _bn_train_t(h, col(_G3), col(_BE3))

    # Layer 4: Linear -> ReLU
    h = jnp.maximum(dense(wstack_ref[2 * H:3 * H, :], h) + col(_B4), 0.0)

    # Head: Linear(H -> 1) + Sigmoid, kept OFF the MXU (VPU multiply + sublane
    # reduce).  Exact exp/divide keeps the output strictly inside (0, 1).
    logit = jnp.sum(h * col(_WADV), axis=0, keepdims=True) + badv_ref[0]  # (1,B)
    out_ref[...] = 1.0 / (1.0 + jnp.exp(-logit))


def discriminator_old_forward(y_fake, x, params):
    """Launch the fused kernel: no grid, everything resident in VMEM/SMEM.

    Runs internally on transposed (features, batch) activations so the batch is
    the lane dimension and the (1, B) output store is lane-dense; the wrapper
    transposes (pure layout plumbing) and restores the (B, 1) module contract.
    BN uses full-batch statistics, so the whole batch must stay in one call.
    """
    B = y_fake.shape[0]
    in_total = params["w1t"].shape[1]
    vmem = pl.BlockSpec(memory_space=pltpu.MemorySpace.VMEM)
    smem = pl.BlockSpec(memory_space=pltpu.MemorySpace.SMEM)

    yt = y_fake.astype(jnp.float32).T        # (output_size, B)
    xt = x.astype(jnp.float32).T             # (input_size, B)

    out_t = pl.pallas_call(
        discriminator_kernel,
        out_shape=jax.ShapeDtypeStruct((1, B), jnp.float32),
        in_specs=[vmem, vmem, vmem, vmem, vmem, smem],
        out_specs=vmem,
        scratch_shapes=[pltpu.VMEM((in_total, B), jnp.float32)],
        # Everything here fits in a few hundred KiB; the explicit limit leaves
        # headroom to raise B per call (amortizing the ~0.35 us launch cost)
        # while staying inside v7x's smaller 64 MiB VMEM.
        compiler_params=pltpu.CompilerParams(vmem_limit_bytes=32 * 1024 * 1024),
    )(yt, xt, params["w1t"], params["w_stack"], params["vecs"], params["badv"])
    # TODO(synk): with grid=() only one TensorCore is used on v7x; independent
    # micro-batches could be stacked on a leading "parallel" grid axis
    # (per-micro-batch BN stats) to occupy both cores.
    return out_t.T                            # (B, 1) module output contract


def init_params(key, input_size, output_size, hidden_dim):
    """Deterministic synthetic parameters (PyTorch-Linear-style uniform init).

    Weights are stored pre-transposed (out, in) in bf16 for the MXU, the three
    hidden weights are stacked into one (3H, H) slab, and all nine per-feature
    vectors live in one (H, 9) f32 slab (biases, BN affine, head weight).
    """
    def linear(k, fan_in, fan_out):
        k1, k2 = jax.random.split(k)
        bound = 1.0 / jnp.sqrt(fan_in)
        w = jax.random.uniform(k1, (fan_in, fan_out), jnp.float32, -bound, bound)
        b = jax.random.uniform(k2, (fan_out,), jnp.float32, -bound, bound)
        return w, b

    ks = jax.random.split(key, 5)
    d_in = input_size + output_size
    w1, b1 = linear(ks[0], d_in, hidden_dim)
    w2, b2 = linear(ks[1], hidden_dim, hidden_dim)
    w3, b3 = linear(ks[2], hidden_dim, hidden_dim)
    w4, b4 = linear(ks[3], hidden_dim, hidden_dim)
    wadv, badv = linear(ks[4], hidden_dim, 1)

    # BatchNorm affine params (PyTorch default init: gamma=1, beta=0).
    g2 = jnp.ones((hidden_dim,), jnp.float32)
    be2 = jnp.zeros((hidden_dim,), jnp.float32)
    g3 = jnp.ones((hidden_dim,), jnp.float32)
    be3 = jnp.zeros((hidden_dim,), jnp.float32)

    vecs = jnp.stack(
        [b1, b2, g2, be2, b3, g3, be3, b4, wadv[:, 0]], axis=1)   # (H, 9) f32

    return dict(
        # concat order is [y_fake, x] -> first output_size columns of W1^T hit y.
        w1t=w1.T.astype(jnp.bfloat16),                             # (H, in+out)
        w_stack=jnp.concatenate([w2.T, w3.T, w4.T], axis=0).astype(jnp.bfloat16),
        vecs=vecs,
        badv=badv.reshape(1),
    )


def reference_forward(y_fake, x, p, use_bf16_matmuls=True):
    """Pure-JAX reference.

    use_bf16_matmuls=True mirrors the kernel's precision (bf16 MXU operands,
    f32 accumulation / elementwise); False is the exact f32 module semantics.
    """
    H = p["vecs"].shape[0]
    v = p["vecs"]
    b1, b2, g2, be2, b3, g3, be3, b4 = (v[:, i][None, :] for i in range(8))
    wadv_col = v[:, _WADV:_WADV + 1]                               # (H, 1)
    w1 = p["w1t"].astype(jnp.float32).T                            # (in+out, H)
    ws = p["w_stack"].astype(jnp.float32)
    w2, w3, w4 = ws[0:H].T, ws[H:2 * H].T, ws[2 * H:3 * H].T

    def mm(a, w):
        if use_bf16_matmuls:
            return jnp.dot(a.astype(jnp.bfloat16), w.astype(jnp.bfloat16),
                           preferred_element_type=jnp.float32)
        return jnp.dot(a, w)

    def bn(h, g, be):
        mu = h.mean(0, keepdims=True)
        var = ((h - mu) ** 2).mean(0, keepdims=True)
        return (h - mu) / jnp.sqrt(var + BN_EPS) * g + be

    cat = jnp.concatenate([y_fake, x], axis=1).astype(jnp.float32)
    h = jnp.maximum(mm(cat, w1) + b1, 0.0)
    h = jnp.maximum(mm(h, w2) + b2, 0.0)
    h = bn(h, g2, be2)
    h = jnp.maximum(mm(h, w3) + b3, 0.0)
    h = bn(h, g3, be3)
    h = jnp.maximum(mm(h, w4) + b4, 0.0)
    return jax.nn.sigmoid(h @ wadv_col + p["badv"])


if __name__ == "__main__":
    batch = 128          # lane-dense output row; kernel is batch-generic
    input_size = 12
    output_size = 4
    hidden_dim = 64      # module default

    key = jax.random.PRNGKey(0)
    k_y, k_x, k_p = jax.random.split(key, 3)
    y_fake = jax.random.normal(k_y, (batch, output_size), jnp.float32)
    x = jax.random.normal(k_x, (batch, input_size), jnp.float32)
    params = init_params(k_p, input_size, output_size, hidden_dim)

    out = discriminator_old_forward(y_fake, x, params)
    out = jax.block_until_ready(out)
    assert out.shape == (batch, 1)

    # Tight check vs. a reference mirroring the kernel's bf16-matmul precision.
    ref = reference_forward(y_fake, x, params, use_bf16_matmuls=True)
    assert jnp.allclose(out, ref, atol=2e-3, rtol=2e-3)

    # Loose sanity check vs. exact f32 module semantics (bounds bf16 drift).
    ref_f32 = reference_forward(y_fake, x, params, use_bf16_matmuls=False)
    assert jnp.max(jnp.abs(out - ref_f32)) < 3e-2

    print("KERNEL_OK")
</pallas_src>

<mosaic_0001>
module attributes {stable_mosaic.version = 11 : i64} {
  func.func @discriminator_kernel(%arg0: memref<4x128xf32, #tpu.memory_space<vmem>>, %arg1: memref<12x128xf32, #tpu.memory_space<vmem>>, %arg2: memref<64x16xbf16, #tpu.memory_space<vmem>>, %arg3: memref<192x64xbf16, #tpu.memory_space<vmem>>, %arg4: memref<64x9xf32, #tpu.memory_space<vmem>>, %arg5: memref<1xf32, #tpu.memory_space<smem>>, %arg6: memref<1x128xf32, #tpu.memory_space<vmem>>, %arg7: memref<16x128xf32, #tpu.memory_space<vmem>>) attributes {dimension_semantics = [], scalar_prefetch = 0 : i64, scratch_operands = 1 : i64, tpu.core_type = #tpu.core_type<tc>} {
    %c0 = arith.constant 0 : index
    %c0_0 = arith.constant 0 : index
    %0 = vector.load %arg0[%c0, %c0_0] : memref<4x128xf32, #tpu.memory_space<vmem>>, vector<4x128xf32>
    %c0_1 = arith.constant 0 : index
    %c0_2 = arith.constant 0 : index
    %1 = vector.load %arg7[%c0_1, %c0_2] : memref<16x128xf32, #tpu.memory_space<vmem>>, vector<4x128xf32>
    tpu.vector_store %arg7[%c0_1, %c0_2], %0 {strides = array<i32>} : memref<16x128xf32, #tpu.memory_space<vmem>>, vector<4x128xf32>,
    %c0_3 = arith.constant 0 : index
    %c0_4 = arith.constant 0 : index
    %2 = vector.load %arg1[%c0_3, %c0_4] : memref<12x128xf32, #tpu.memory_space<vmem>>, vector<12x128xf32>
    %c4 = arith.constant 4 : index
    %c0_5 = arith.constant 0 : index
    %3 = vector.load %arg7[%c4, %c0_5] : memref<16x128xf32, #tpu.memory_space<vmem>>, vector<12x128xf32>
    tpu.vector_store %arg7[%c4, %c0_5], %2 {strides = array<i32>} : memref<16x128xf32, #tpu.memory_space<vmem>>, vector<12x128xf32>,
    %c0_6 = arith.constant 0 : index
    %c0_7 = arith.constant 0 : index
    %4 = vector.load %arg2[%c0_6, %c0_7] : memref<64x16xbf16, #tpu.memory_space<vmem>>, vector<64x16xbf16>
    %c0_8 = arith.constant 0 : index
    %c0_9 = arith.constant 0 : index
    %5 = vector.load %arg7[%c0_8, %c0_9] : memref<16x128xf32, #tpu.memory_space<vmem>>, vector<16x128xf32>
    %6 = arith.truncf %5 : vector<16x128xf32> to vector<16x128xbf16>
    %cst = arith.constant dense<0.000000e+00> : vector<64x128xf32>
    %7 = tpu.matmul %4, %6, %cst {dimension_numbers = #tpu.dot_dimension_numbers<[1], [0], [0], [1], [0, 0, 1, 1], [], []>} : vector<64x16xbf16>, vector<16x128xbf16>, vector<64x128xf32> -> vector<64x128xf32>
    %c0_10 = arith.constant 0 : index
    %c0_11 = arith.constant 0 : index
    %8 = vector.load %arg4[%c0_10, %c0_11] : memref<64x9xf32, #tpu.memory_space<vmem>>, vector<64x1xf32>
    %9 = vector.broadcast %8 : vector<64x1xf32> to vector<64x128xf32>
    %10 = arith.addf %7, %9 : vector<64x128xf32>
    %cst_12 = arith.constant 0.000000e+00 : f32
    %11 = vector.broadcast %cst_12 : f32 to vector<64x128xf32>
    %12 = arith.maximumf %10, %11 : vector<64x128xf32>
    %c0_13 = arith.constant 0 : index
    %c0_14 = arith.constant 0 : index
    %13 = vector.load %arg3[%c0_13, %c0_14] : memref<192x64xbf16, #tpu.memory_space<vmem>>, vector<64x64xbf16>
    %14 = arith.truncf %12 : vector<64x128xf32> to vector<64x128xbf16>
    %cst_15 = arith.constant dense<0.000000e+00> : vector<64x128xf32>
    %15 = tpu.matmul %13, %14, %cst_15 {dimension_numbers = #tpu.dot_dimension_numbers<[1], [0], [0], [1], [0, 0, 1, 1], [], []>} : vector<64x64xbf16>, vector<64x128xbf16>, vector<64x128xf32> -> vector<64x128xf32>
    %c0_16 = arith.constant 0 : index
    %c1 = arith.constant 1 : index
    %16 = vector.load %arg4[%c0_16, %c1] : memref<64x9xf32, #tpu.memory_space<vmem>>, vector<64x1xf32>
    %17 = vector.broadcast %16 : vector<64x1xf32> to vector<64x128xf32>
    %18 = arith.addf %15, %17 : vector<64x128xf32>
    %cst_17 = arith.constant 0.000000e+00 : f32
    %19 = vector.broadcast %cst_17 : f32 to vector<64x128xf32>
    %20 = arith.maximumf %18, %19 : vector<64x128xf32>
    %c0_18 = arith.constant 0 : index
    %c2 = arith.constant 2 : index
    %21 = vector.load %arg4[%c0_18, %c2] : memref<64x9xf32, #tpu.memory_space<vmem>>, vector<64x1xf32>
    %c0_19 = arith.constant 0 : index
    %c3 = arith.constant 3 : index
    %22 = vector.load %arg4[%c0_19, %c3] : memref<64x9xf32, #tpu.memory_space<vmem>>, vector<64x1xf32>
    %cst_20 = arith.constant dense<0.000000e+00> : vector<64xf32>
    %23 = vector.multi_reduction <add>, %20, %cst_20 [1] : vector<64x128xf32> to vector<64xf32>
    %24 = vector.shape_cast %23 : vector<64xf32> to vector<64x1xf32>
    %cst_21 = arith.constant 1.280000e+02 : f32
    %25 = vector.broadcast %cst_21 : f32 to vector<64x1xf32>
    %26 = arith.divf %24, %25 : vector<64x1xf32>
    %27 = vector.broadcast %26 : vector<64x1xf32> to vector<64x128xf32>
    %28 = arith.subf %20, %27 : vector<64x128xf32>
    %29 = arith.mulf %28, %28 : vector<64x128xf32>
    %cst_22 = arith.constant dense<0.000000e+00> : vector<64xf32>
    %30 = vector.multi_reduction <add>, %29, %cst_22 [1] : vector<64x128xf32> to vector<64xf32>
    %31 = vector.shape_cast %30 : vector<64xf32> to vector<64x1xf32>
    %cst_23 = arith.constant 1.280000e+02 : f32
    %32 = vector.broadcast %cst_23 : f32 to vector<64x1xf32>
    %33 = arith.divf %31, %32 : vector<64x1xf32>
    %cst_24 = arith.constant 9.99999974E-6 : f32
    %34 = vector.broadcast %cst_24 : f32 to vector<64x1xf32>
    %35 = arith.addf %33, %34 : vector<64x1xf32>
    %36 = math.rsqrt %35 : vector<64x1xf32>
    %37 = arith.mulf %21, %36 : vector<64x1xf32>
    %38 = arith.mulf %26, %37 : vector<64x1xf32>
    %39 = arith.subf %22, %38 : vector<64x1xf32>
    %40 = vector.broadcast %37 : vector<64x1xf32> to vector<64x128xf32>
    %41 = arith.mulf %20, %40 : vector<64x128xf32>
    %42 = vector.broadcast %39 : vector<64x1xf32> to vector<64x128xf32>
    %43 = arith.addf %41, %42 : vector<64x128xf32>
    %c64 = arith.constant 64 : index
    %c0_25 = arith.constant 0 : index
    %44 = vector.load %arg3[%c64, %c0_25] : memref<192x64xbf16, #tpu.memory_space<vmem>>, vector<64x64xbf16>
    %45 = arith.truncf %43 : vector<64x128xf32> to vector<64x128xbf16>
    %cst_26 = arith.constant dense<0.000000e+00> : vector<64x128xf32>
    %46 = tpu.matmul %44, %45, %cst_26 {dimension_numbers = #tpu.dot_dimension_numbers<[1], [0], [0], [1], [0, 0, 1, 1], [], []>} : vector<64x64xbf16>, vector<64x128xbf16>, vector<64x128xf32> -> vector<64x128xf32>
    %c0_27 = arith.constant 0 : index
    %c4_28 = arith.constant 4 : index
    %47 = vector.load %arg4[%c0_27, %c4_28] : memref<64x9xf32, #tpu.memory_space<vmem>>, vector<64x1xf32>
    %48 = vector.broadcast %47 : vector<64x1xf32> to vector<64x128xf32>
    %49 = arith.addf %46, %48 : vector<64x128xf32>
    %cst_29 = arith.constant 0.000000e+00 : f32
    %50 = vector.broadcast %cst_29 : f32 to vector<64x128xf32>
    %51 = arith.maximumf %49, %50 : vector<64x128xf32>
    %c0_30 = arith.constant 0 : index
    %c5 = arith.constant 5 : index
    %52 = vector.load %arg4[%c0_30, %c5] : memref<64x9xf32, #tpu.memory_space<vmem>>, vector<64x1xf32>
    %c0_31 = arith.constant 0 : index
    %c6 = arith.constant 6 : index
    %53 = vector.load %arg4[%c0_31, %c6] : memref<64x9xf32, #tpu.memory_space<vmem>>, vector<64x1xf32>
    %cst_32 = arith.constant dense<0.000000e+00> : vector<64xf32>
    %54 = vector.multi_reduction <add>, %51, %cst_32 [1] : vector<64x128xf32> to vector<64xf32>
    %55 = vector.shape_cast %54 : vector<64xf32> to vector<64x1xf32>
    %cst_33 = arith.constant 1.280000e+02 : f32
    %56 = vector.broadcast %cst_33 : f32 to vector<64x1xf32>
    %57 = arith.divf %55, %56 : vector<64x1xf32>
    %58 = vector.broadcast %57 : vector<64x1xf32> to vector<64x128xf32>
    %59 = arith.subf %51, %58 : vector<64x128xf32>
    %60 = arith.mulf %59, %59 : vector<64x128xf32>
    %cst_34 = arith.constant dense<0.000000e+00> : vector<64xf32>
    %61 = vector.multi_reduction <add>, %60, %cst_34 [1] : vector<64x128xf32> to vector<64xf32>
    %62 = vector.shape_cast %61 : vector<64xf32> to vector<64x1xf32>
    %cst_35 = arith.constant 1.280000e+02 : f32
    %63 = vector.broadcast %cst_35 : f32 to vector<64x1xf32>
    %64 = arith.divf %62, %63 : vector<64x1xf32>
    %cst_36 = arith.constant 9.99999974E-6 : f32
    %65 = vector.broadcast %cst_36 : f32 to vector<64x1xf32>
    %66 = arith.addf %64, %65 : vector<64x1xf32>
    %67 = math.rsqrt %66 : vector<64x1xf32>
    %68 = arith.mulf %52, %67 : vector<64x1xf32>
    %69 = arith.mulf %57, %68 : vector<64x1xf32>
    %70 = arith.subf %53, %69 : vector<64x1xf32>
    %71 = vector.broadcast %68 : vector<64x1xf32> to vector<64x128xf32>
    %72 = arith.mulf %51, %71 : vector<64x128xf32>
    %73 = vector.broadcast %70 : vector<64x1xf32> to vector<64x128xf32>
    %74 = arith.addf %72, %73 : vector<64x128xf32>
    %c128 = arith.constant 128 : index
    %c0_37 = arith.constant 0 : index
    %75 = vector.load %arg3[%c128, %c0_37] : memref<192x64xbf16, #tpu.memory_space<vmem>>, vector<64x64xbf16>
    %76 = arith.truncf %74 : vector<64x128xf32> to vector<64x128xbf16>
    %cst_38 = arith.constant dense<0.000000e+00> : vector<64x128xf32>
    %77 = tpu.matmul %75, %76, %cst_38 {dimension_numbers = #tpu.dot_dimension_numbers<[1], [0], [0], [1], [0, 0, 1, 1], [], []>} : vector<64x64xbf16>, vector<64x128xbf16>, vector<64x128xf32> -> vector<64x128xf32>
    %c0_39 = arith.constant 0 : index
    %c7 = arith.constant 7 : index
    %78 = vector.load %arg4[%c0_39, %c7] : memref<64x9xf32, #tpu.memory_space<vmem>>, vector<64x1xf32>
    %79 = vector.broadcast %78 : vector<64x1xf32> to vector<64x128xf32>
    %80 = arith.addf %77, %79 : vector<64x128xf32>
    %cst_40 = arith.constant 0.000000e+00 : f32
    %81 = vector.broadcast %cst_40 : f32 to vector<64x128xf32>
    %82 = arith.maximumf %80, %81 : vector<64x128xf32>
    %c0_41 = arith.constant 0 : index
    %c8 = arith.constant 8 : index
    %83 = vector.load %arg4[%c0_41, %c8] : memref<64x9xf32, #tpu.memory_space<vmem>>, vector<64x1xf32>
    %84 = vector.broadcast %83 : vector<64x1xf32> to vector<64x128xf32>
    %85 = arith.mulf %82, %84 : vector<64x128xf32>
    %cst_42 = arith.constant dense<0.000000e+00> : vector<128xf32>
    %86 = vector.multi_reduction <add>, %85, %cst_42 [0] : vector<64x128xf32> to vector<128xf32>
    %87 = vector.shape_cast %86 : vector<128xf32> to vector<1x128xf32>
    %c0_43 = arith.constant 0 : index
    %88 = memref.load %arg5[%c0_43] : memref<1xf32, #tpu.memory_space<smem>>
    %89 = vector.broadcast %88 : f32 to vector<1x128xf32>
    %90 = arith.addf %87, %89 : vector<1x128xf32>
    %cst_44 = arith.constant 0.000000e+00 : f32
    %91 = vector.broadcast %cst_44 : f32 to vector<1x128xf32>
    %92 = arith.subf %91, %90 : vector<1x128xf32>
    %93 = math.exp %92 : vector<1x128xf32>
    %cst_45 = arith.constant 1.000000e+00 : f32
    %94 = vector.broadcast %cst_45 : f32 to vector<1x128xf32>
    %95 = arith.addf %94, %93 : vector<1x128xf32>
    %cst_46 = arith.constant 1.000000e+00 : f32
    %96 = vector.broadcast %cst_46 : f32 to vector<1x128xf32>
    %97 = arith.divf %96, %95 : vector<1x128xf32>
    %c0_47 = arith.constant 0 : index
    %c0_48 = arith.constant 0 : index
    %98 = vector.load %arg6[%c0_47, %c0_48] : memref<1x128xf32, #tpu.memory_space<vmem>>, vector<1x128xf32>
    tpu.vector_store %arg6[%c0_47, %c0_48], %97 {strides = array<i32>} : memref<1x128xf32, #tpu.memory_space<vmem>>, vector<1x128xf32>,
    return
  }
}

</mosaic_0001>

<bundles_post_ra>
// kernel: tpu_custom_call.1
= control target key start
LH: loop header
LB: loop body
LE: loop exit
PB: predicated region body
PF: predicated region fallthrough
CT: control target
= control target key end

     0   :  { %vm111_vm0 = vcmask 130048   ;;  %v1436_v4 = vmov 0   ;;  %s1849_s0 = inlined_call_operand.vmem [shape: f32[4,128], index: 0, kind: input, shape index: {}]   ;;  %s1850_s1 = inlined_call_operand.vmem [shape: f32[12,128], index: 1, kind: input, shape index: {}]   ;;  %s1851_s2 = inlined_call_operand.vmem [shape: bf16[64,16], index: 2, kind: input, shape index: {}]   ;;  %s1852_s3 = inlined_call_operand.vmem [shape: bf16[192,64], index: 3, kind: input, shape index: {}]   ;;  %s1853_s4 = inlined_call_operand.vmem [shape: f32[64,9], index: 4, kind: input, shape index: {}]   ;;  %s1854_s5 = inlined_call_operand.<no memory space> [shape: f32[1], index: 5, kind: input, shape index: {}]   ;;  %s1855_s6 = inlined_call_operand.hbm [shape: f32[1,128], index: 6, kind: output, shape index: {}]  }
   0x1   :  { %v26_v0 = vld [vmem:[%s1849_s0] sm:$0xf]  ;;  %v29_v2 = vld [vmem:[%s1850_s1 + $0x8] sm:$0xf]  ;;  %1325 = vset.pattern.permute.xlu0 %v1436_v4  ;;  %1326 = vset.pattern.permute.xlu1 %v1436_v4  ;;  %v1503_v6 = vld [vmem:[%s1853_s4 + $0x10] sm:$0xff] }
   0x2   :  { %v28_v1 = vld [vmem:[%s1850_s1] sm:$0xff]  ;;  %27 = vst [vmem:[#allocation2] sm:$0xf] %v26_v0  ;;  %31 = vst [vmem:[#allocation2 + $0xc] sm:$0xf] %v29_v2  ;;  %63 = vperm.xlu1 %1326, %v1503_v6   ;;  %v1510_v7 = vld [vmem:[%s1853_s4 + $0x8] sm:$0xff] }
   0x3   :  { %30 = vst [vmem:[#allocation2 + $0x4] sm:$0xff] %v28_v1  ;;  %v1352_v3 = vld [vmem:[%s1851_s2] sm:$0xff]   ;;  %v1515_v8 = vld [vmem:[%s1853_s4 + $0x18] sm:$0xff]  ;;  %v1353_v12 = vld [vmem:[%s1851_s2 + $0x8] sm:$0xff]  }
   0x4   :  { %1250 = vmatprep.mubr.msk.bf16.mxu0 %vm111_vm0, %v1352_v3  ;;  %v1498_v5 = vld [vmem:[%s1853_s4] sm:$0xff]  ;;  %v1528_v14 = vld [vmem:[%s1853_s4 + $0x28] sm:$0xff]  ;;  %v1354_v15 = vld [vmem:[%s1851_s2 + $0x10] sm:$0xff]  }
   0x5   :  { %53 = vperm.xlu0 %1325, %v1498_v5   ;;  %v1523_v13 = vld [vmem:[%s1853_s4 + $0x20] sm:$0xff]  ;;  %v1538_v16 = vld [vmem:[%s1853_s4 + $0x30] sm:$0xff]  ;;  %v1543_v17 = vld [vmem:[%s1853_s4 + $0x38] sm:$0xff] }
   0x6   :  { %68 = vperm.xlu1 %1326, %v1515_v8  }
   0x9   :  { %58 = vperm.xlu0 %1325, %v1510_v7  }
   0xa   :  { %v40_v9 = vld [vmem:[#allocation2] sm:$0xff]  ;;  %v41_v10 = vld [vmem:[#allocation2 + $0x8] sm:$0xff]  ;;  %78 = vperm.xlu1 %1326, %v1528_v14  }
   0xb   :  { %v42_v11 = vpack.c.bf16 %v41_v10, %v40_v9 }
   0xd   :  { %1248 = vmatprep.subr.bf16.mxu0 %v42_v11  ;;  %73 = vperm.xlu0 %1325, %v1523_v13  }
   0xe   :  { %1249 = vmatpush3.bf16.msra.mxu0 %v42_v11 }
  0x11   :  { %1251 = vmatmul.mubr.msk.bf16.vlgmr.msra.gmra.mrb[0].mxu0 %vm111_vm0, %v1353_v12 }
  0x12   :  { %1254 = vmatprep.mubr.msk.bf16.mxu0 %vm111_vm0, %v1354_v15 }
  0x13   :  { %12 = vsyncpa [#allocation5], 0  ;;  %83 = vperm.xlu0 %1325, %v1538_v16   ;;  %88 = vperm.xlu1 %1326, %v1543_v17   ;;  %v1355_v18 = vld [vmem:[%s1851_s2 + $0x18] sm:$0xff]   ;;  %v1356_v19 = vld [vmem:[%s1852_s3] sm:$0xff]   ;;  %vm261_vm1 = vcmask 523264   ;;  %v1437_v20 = vmov 1  }
  0x14   :  { %1266 = vmatprep.mubr.msk.bf16.mxu1 %vm261_vm1, %v1356_v19  ;;  %v1357_v57 = vld [vmem:[%s1852_s3 + $0x8] sm:$0xff]   ;;  %v1358_v58 = vld [vmem:[%s1852_s3 + $0x10] sm:$0xff]   ;;  %v1359_v59 = vld [vmem:[%s1852_s3 + $0x18] sm:$0xff]   ;;  %s1439_s1 = smov 1   ;;  %s1446_s12 = smov [#allocation4]  }
  0x15   :  { %s1179_s13 = sshll.u32 %s1446_s12, 4  ;;  %s1180_s13 = int_to_ptr.vmem [resolvable:$true] %s1179_s13 }
  0x16   :  { %s1412_s14 = scalar_lea.vmem %s1180_s13, 16  ;;  %s1416_s15 = scalar_lea.vmem %s1180_s13, 32 }
  0x17   :  { %1328 = vset.pattern.permute.xlu1 %v1437_v20  ;;  %1327 = vset.pattern.permute.xlu0 %v1437_v20  ;;  %p1413_p0 = scmp.ne.s32.totalorder %s1180_s13, %s1412_s14  ;;  %p1417_p1 = scmp.lt.s32.totalorder %s1180_s13, %s1180_s13 }
  0x18   :  { %214 = vperm.xlu1 %1328, %v1510_v7   ;;  %210 = vperm.xlu0 %1327, %v1498_v5   ;;  %p1418_p2 = scmp.lt.s32.totalorder %s1416_s15, %s1412_s14 }
  0x19   :  { %1255 = vmatmul.mubr.msk.bf16.gmra.mrb[4].mxu0 %vm111_vm0, %v1355_v18 }
  0x1a   :  { %p1419_p3 = por %p1418_p2, %p1417_p1 }
  0x1c   :  { %218 = vperm.xlu1 %1328, %v1503_v6   ;;  %222 = vperm.xlu0 %1327, %v1515_v8   ;;  %p1420_p4 = pnand %p1419_p3, %p1413_p0 }
  0x20   :  { %226 = vperm.xlu1 %1328, %v1523_v13   ;;  %230 = vperm.xlu0 %1327, %v1528_v14  }
  0x24   :  { %234 = vperm.xlu1 %1328, %v1538_v16   ;;  %238 = vperm.xlu0 %1327, %v1543_v17  }
  0x81   :  { %v64_v22 = vpop.permute.xlu1 %63 }
  0x84   :  { %v54_v21 = vpop.permute.xlu0 %53 }
  0x85   :  { %v69_v24 = vpop.permute.xlu1 %68 }
  0x88   :  { %v59_v23 = vpop.permute.xlu0 %58 }
  0x89   :  { %v79_v33 = vpop.permute.xlu1 %78 }
  0x8c   :  { %v74_v28 = vpop.permute.xlu0 %73 }
  0x92   :  { %v84_v40 = vpop.permute.xlu0 %83  ;;  %v89_v45 = vpop.permute.xlu1 %88 }
  0x97   :  { %v215_v60 = vpop.permute.xlu1 %214  ;;  %v211_v61 = vpop.permute.xlu0 %210 }
  0x9b   :  { %v219_v62 = vpop.permute.xlu1 %218  ;;  %v223_v0 = vpop.permute.xlu0 %222 }
  0x9f   :  { %v227_v18 = vpop.permute.xlu1 %226  ;;  %v231_v19 = vpop.permute.xlu0 %230 }
  0xe4   :  { %v1252_v25 = vpop.f32.mrb[0].mxu0 }
  0xe5   :  { %v167_v26 = vadd.f32 %v1252_v25, %v64_v22  ;;  %v158_v27 = vpop.f32.mrb[1].mxu0 }
  0xe6   :  { %v159_v29 = vadd.f32 %v158_v27, %v54_v21  ;;  %v1253_v30 = vpop.f32.mrb[2].mxu0 }
  0xe7   :  { %v170_v31 = vadd.f32 %v1253_v30, %v69_v24  ;;  %v161_v32 = vpop.f32.mrb[3].mxu0  ;;  %v191_v35 = vmax.f32 %v167_v26, 0.0 }
  0xe8   :  { %v162_v34 = vadd.f32 %v161_v32, %v59_v23  ;;  %v189_v37 = vmax.f32 %v159_v29, 0.0  ;;  %v239_v29 = vpop.permute.xlu0 %238 }
  0xe9   :  { %v192_v36 = vmax.f32 %v170_v31, 0.0 }
  0xea   :  { %v190_v38 = vmax.f32 %v162_v34, 0.0 }
  0xeb   :  { %v206_v39 = vpack.c.bf16 %v192_v36, %v191_v35 }
  0xec   :  { %v1256_v41 = vpop.f32.mrb[4].mxu0  ;;  %v205_v42 = vpack.c.bf16 %v190_v38, %v189_v37 }
  0xed   :  { %v183_v43 = vadd.f32 %v1256_v41, %v84_v40  ;;  %v174_v44 = vpop.f32.mrb[5].mxu0 }
  0xee   :  { %v175_v46 = vadd.f32 %v174_v44, %v74_v28  ;;  %v1257_v47 = vpop.f32.mrb[6].mxu0  ;;  %1258 = vmatprep.subr.bf16.mxu1 %v205_v42  ;;  %v235_v28 = vpop.permute.xlu1 %234 }
  0xef   :  { %v186_v48 = vadd.f32 %v1257_v47, %v89_v45  ;;  %v177_v49 = vpop.f32.mrb[7].mxu0  ;;  %1259 = vmatpush3.bf16.msra.mxu1 %v205_v42  ;;  %v195_v51 = vmax.f32 %v183_v43, 0.0 }
  0xf0   :  { %v178_v50 = vadd.f32 %v177_v49, %v79_v33  ;;  %1260 = vmatprep.subr.bf16.mxu1 %v206_v39  ;;  %v193_v53 = vmax.f32 %v175_v46, 0.0 }
  0xf1   :  { %v196_v52 = vmax.f32 %v186_v48, 0.0 }
  0xf2   :  { %v194_v54 = vmax.f32 %v178_v50, 0.0 }
  0xf3   :  { %v208_v55 = vpack.c.bf16 %v196_v52, %v195_v51  ;;  %1261 = vmatpush3.bf16.msra.mxu1 %v206_v39 }
  0xf4   :  { %v207_v56 = vpack.c.bf16 %v194_v54, %v193_v53 }
  0xf6   :  { %1262 = vmatprep.subr.bf16.mxu1 %v207_v56 }
  0xf7   :  { %1263 = vmatpush3.bf16.msra.mxu1 %v207_v56 }
  0xf8   :  { %1264 = vmatprep.subr.bf16.mxu1 %v208_v55 }
  0xfb   :  { %1265 = vmatpush3.bf16.msra.mxu1 %v208_v55 }
  0xfe   :  { %1267 = vmatmul.mubr.msk.bf16.vlgmr.msra.gmra.mrb[0].mxu1 %vm261_vm1, %v1357_v57 }
  0xff   :  { %1270 = vmatprep.mubr.msk.bf16.mxu1 %vm261_vm1, %v1358_v58 }
 0x106   :  { %1271 = vmatmul.mubr.msk.bf16.gmra.mrb[4].mxu1 %vm261_vm1, %v1359_v59 }
 0x1d1   :  { %v1268_v63 = vpop.f32.mrb[0].mxu1 }
 0x1d2   :  { %v308_v1 = vpop.f32.mrb[1].mxu1  ;;  %v317_v12 = vadd.f32 %v1268_v63, %v219_v62 }
 0x1d3   :  { %v309_v2 = vadd.f32 %v308_v1, %v211_v61  ;;  %v1269_v3 = vpop.f32.mrb[2].mxu1 }
 0x1d4   :  { %v311_v4 = vpop.f32.mrb[3].mxu1  ;;  %v320_v10 = vadd.f32 %v1269_v3, %v223_v0  ;;  %v1587_v23 = vmax.f32 %v317_v12, 0.0 }
 0x1d5   :  { %v1579_v9 = vmax.f32 %v309_v2, 0.0  ;;  %v312_v11 = vadd.f32 %v311_v4, %v215_v60  ;;  %v1438_v4 = vmov 2  }
 0x1d6   :  { %v1584_v20 = vmax.f32 %v320_v10, 0.0  ;;  %1329 = vset.pattern.permute.xlu1 %v1438_v4  ;;  %1330 = vset.pattern.permute.xlu0 %v1438_v4 }
 0x1d7   :  { %v1581_v15 = vmax.f32 %v312_v11, 0.0  ;;  %347 = vadd.xlane.f32.xlu1 %v1579_v9 }
 0x1d9   :  { %v1272_v21 = vpop.f32.mrb[4].mxu1  ;;  %349 = vadd.xlane.f32.xlu0 %v1581_v15 }
 0x1da   :  { %v324_v22 = vpop.f32.mrb[5].mxu1  ;;  %v333_v30 = vadd.f32 %v1272_v21, %v235_v28 }
 0x1db   :  { %v325_v24 = vadd.f32 %v324_v22, %v227_v18  ;;  %v1273_v25 = vpop.f32.mrb[6].mxu1  ;;  %353 = vadd.xlane.f32.xlu1 %v1584_v20 }
 0x1dc   :  { %v327_v26 = vpop.f32.mrb[7].mxu1  ;;  %v336_v32 = vadd.f32 %v1273_v25, %v239_v29  ;;  %v1597_v34 = vmax.f32 %v333_v30, 0.0 }
 0x1dd   :  { %v328_v27 = vadd.f32 %v327_v26, %v231_v19  ;;  %351 = vadd.xlane.f32.xlu0 %v1587_v23  ;;  %v1591_v31 = vmax.f32 %v325_v24, 0.0 }
 0x1de   :  { %v1599_v35 = vmax.f32 %v336_v32, 0.0 }
 0x1df   :  { %v1593_v33 = vmax.f32 %v328_v27, 0.0 }
 0x1e1   :  { %355 = vadd.xlane.f32.xlu0 %v1591_v31  ;;  %357 = vadd.xlane.f32.xlu1 %v1593_v33 }
 0x1e5   :  { %359 = vadd.xlane.f32.xlu0 %v1597_v34  ;;  %361 = vadd.xlane.f32.xlu1 %v1599_v35 }
 0x264   :  { %v348_v36 = vpop.xlane.xlu1 %347 }
 0x265   :  { %v1603_v37 = vmul.f32 0.0078125, %v348_v36 }
 0x266   :  { %v350_v38 = vpop.xlane.xlu0 %349 }
 0x267   :  { %v1605_v39 = vmul.f32 0.0078125, %v350_v38  ;;  %v372_v40 = vsub.f32 %v1579_v9, %v1603_v37 }
 0x268   :  { %v354_v41 = vpop.xlane.xlu1 %353 }
 0x269   :  { %v1609_v42 = vmul.f32 0.0078125, %v354_v41  ;;  %v380_v43 = vmul.f32 %v372_v40, %v372_v40  ;;  %v373_v44 = vsub.f32 %v1581_v15, %v1605_v39 }
 0x26a   :  { %v352_v45 = vpop.xlane.xlu0 %351 }
 0x26b   :  { %v1613_v46 = vmul.f32 0.0078125, %v352_v45  ;;  %388 = vadd.xlane.f32.xlu0 %v380_v43  ;;  %v381_v47 = vmul.f32 %v373_v44, %v373_v44  ;;  %v375_v48 = vsub.f32 %v1584_v20, %v1609_v42 }
 0x26d   :  { %390 = vadd.xlane.f32.xlu1 %v381_v47  ;;  %v374_v49 = vsub.f32 %v1587_v23, %v1613_v46  ;;  %v383_v55 = vmul.f32 %v375_v48, %v375_v48 }
 0x26e   :  { %v356_v50 = vpop.xlane.xlu0 %355  ;;  %v358_v51 = vpop.xlane.xlu1 %357 }
 0x26f   :  { %v1619_v52 = vmul.f32 0.0078125, %v356_v50  ;;  %v1621_v53 = vmul.f32 0.0078125, %v358_v51  ;;  %v382_v54 = vmul.f32 %v374_v49, %v374_v49 }
 0x271   :  { %392 = vadd.xlane.f32.xlu0 %v382_v54  ;;  %394 = vadd.xlane.f32.xlu1 %v383_v55  ;;  %v376_v56 = vsub.f32 %v1591_v31, %v1619_v52  ;;  %v377_v57 = vsub.f32 %v1593_v33, %v1621_v53 }
 0x272   :  { %v360_v58 = vpop.xlane.xlu0 %359  ;;  %v362_v59 = vpop.xlane.xlu1 %361 }
 0x273   :  { %v1627_v60 = vmul.f32 0.0078125, %v360_v58  ;;  %v1629_v61 = vmul.f32 0.0078125, %v362_v59  ;;  %v384_v62 = vmul.f32 %v376_v56, %v376_v56  ;;  %v385_v63 = vmul.f32 %v377_v57, %v377_v57 }
 0x275   :  { %396 = vadd.xlane.f32.xlu0 %v384_v62  ;;  %398 = vadd.xlane.f32.xlu1 %v385_v63  ;;  %v378_v0 = vsub.f32 %v1597_v34, %v1627_v60  ;;  %v379_v1 = vsub.f32 %v1599_v35, %v1629_v61 }
 0x277   :  { %v386_v2 = vmul.f32 %v378_v0, %v378_v0  ;;  %v387_v3 = vmul.f32 %v379_v1, %v379_v1 }
 0x279   :  { %400 = vadd.xlane.f32.xlu0 %v386_v2  ;;  %402 = vadd.xlane.f32.xlu1 %v387_v3 }
 0x2f8   :  { %v389_v10 = vpop.xlane.xlu0 %388 }
 0x2f9   :  { %v404_v11 = vmul.f32 0.0078125, %v389_v10 }
 0x2fa   :  { %v391_v12 = vpop.xlane.xlu1 %390 }
 0x2fb   :  { %v412_v18 = vadd.f32 1e-05, %v404_v11  ;;  %v405_v19 = vmul.f32 0.0078125, %v391_v12 }
 0x2fd   :  { %1368 = vrsqrt.f32 %v412_v18  ;;  %v413_v21 = vadd.f32 1e-05, %v405_v19 }
 0x2fe   :  { %v393_v22 = vpop.xlane.xlu0 %392  ;;  %v395_v24 = vpop.xlane.xlu1 %394 }
 0x2ff   :  { %1370 = vrsqrt.f32 %v413_v21  ;;  %v406_v25 = vmul.f32 0.0078125, %v393_v22  ;;  %v407_v26 = vmul.f32 0.0078125, %v395_v24 }
 0x301   :  { %v414_v27 = vadd.f32 1e-05, %v406_v25  ;;  %v415_v28 = vadd.f32 1e-05, %v407_v26 }
 0x302   :  { %v397_v29 = vpop.xlane.xlu0 %396  ;;  %v399_v30 = vpop.xlane.xlu1 %398 }
 0x303   :  { %1372 = vrsqrt.f32 %v414_v27  ;;  %v408_v32 = vmul.f32 0.0078125, %v397_v29  ;;  %v409_v36 = vmul.f32 0.0078125, %v399_v30 }
 0x304   :  { %1374 = vrsqrt.f32 %v415_v28 }
 0x305   :  { %v416_v38 = vadd.f32 1e-05, %v408_v32  ;;  %v417_v40 = vadd.f32 1e-05, %v409_v36 }
 0x306   :  { %v401_v41 = vpop.xlane.xlu0 %400  ;;  %v403_v43 = vpop.xlane.xlu1 %402 }
 0x307   :  { %v1369_v44 = vpop.eup %1368  ;;  %1376 = vrsqrt.f32 %v416_v38  ;;  %v410_v45 = vmul.f32 0.0078125, %v401_v41  ;;  %v411_v47 = vmul.f32 0.0078125, %v403_v43  ;;  %v1441_v41 = vmov 4  }
 0x308   :  { %1378 = vrsqrt.f32 %v417_v40  ;;  %v428_v48 = vmul.f32 %v1369_v44, %v1498_v5 }
 0x309   :  { %v1371_v49 = vpop.eup %1370  ;;  %v418_v50 = vadd.f32 1e-05, %v410_v45  ;;  %v419_v51 = vadd.f32 1e-05, %v411_v47 }
 0x30a   :  { %v436_v54 = vmul.f32 %v428_v48, %v1603_v37  ;;  %v429_v55 = vmul.f32 %v1371_v49, %v1510_v7 }
 0x30b   :  { %1380 = vrsqrt.f32 %v418_v50 }
 0x30c   :  { %1382 = vrsqrt.f32 %v419_v51  ;;  %452 = vrot.lane.b32.xlu0 %v436_v54, %s1439_s1  ;;  %v437_v56 = vmul.f32 %v429_v55, %v1605_v39 }
 0x30d   :  { %v1373_v57 = vpop.eup %1372 }
 0x30e   :  { %v1375_v58 = vpop.eup %1374  ;;  %454 = vrot.lane.b32.xlu1 %v437_v56, %s1439_s1  ;;  %v430_v59 = vmul.f32 %v1373_v57, %v1503_v6 }
 0x30f   :  { %v431_v62 = vmul.f32 %v1375_v58, %v1515_v8 }
 0x310   :  { %v438_v63 = vmul.f32 %v430_v59, %v1613_v46 }
 0x311   :  { %v1377_v37 = vpop.eup %1376  ;;  %v439_v0 = vmul.f32 %v431_v62, %v1609_v42 }
 0x312   :  { %v1379_v1 = vpop.eup %1378  ;;  %456 = vrot.lane.b32.xlu1 %v438_v63, %s1439_s1  ;;  %v432_v2 = vmul.f32 %v1377_v37, %v1523_v13 }
 0x313   :  { %458 = vrot.lane.b32.xlu0 %v439_v0, %s1439_s1  ;;  %v433_v39 = vmul.f32 %v1379_v1, %v1528_v14 }
 0x314   :  { %v440_v3 = vmul.f32 %v432_v2, %v1619_v52  ;;  %v1440_v52 = vmov 3  }
 0x315   :  { %v1381_v10 = vpop.eup %1380  ;;  %v441_v11 = vmul.f32 %v433_v39, %v1621_v53 }
 0x316   :  { %v1383_v12 = vpop.eup %1382  ;;  %460 = vrot.lane.b32.xlu1 %v440_v3, %s1439_s1  ;;  %v434_v46 = vmul.f32 %v1381_v10, %v1538_v16 }
 0x317   :  { %462 = vrot.lane.b32.xlu0 %v441_v11, %s1439_s1  ;;  %v435_v42 = vmul.f32 %v1383_v12, %v1543_v17 }
 0x318   :  { %v442_v18 = vmul.f32 %v434_v46, %v1627_v60 }
 0x319   :  { %v443_v19 = vmul.f32 %v435_v42, %v1629_v61 }
 0x31a   :  { %464 = vrot.lane.b32.xlu1 %v442_v18, %s1439_s1 }
 0x31b   :  { %466 = vrot.lane.b32.xlu0 %v443_v19, %s1439_s1 }
 0x31e   :  { %486 = vperm.xlu1 %1329, %v428_v48  }
 0x31f   :  { %491 = vperm.xlu0 %1330, %v429_v55  }
 0x322   :  { %501 = vperm.xlu1 %1329, %v431_v62  }
 0x323   :  { %496 = vperm.xlu0 %1330, %v430_v59  }
 0x326   :  { %506 = vperm.xlu1 %1329, %v432_v2  }
 0x327   :  { %511 = vperm.xlu0 %1330, %v433_v39  }
 0x32a   :  { %521 = vperm.xlu1 %1329, %v435_v42  }
 0x32b   :  { %1331 = vset.pattern.permute.xlu0 %v1440_v52 }
 0x32e   :  { %1333 = vset.pattern.permute.xlu1 %v1440_v52 }
 0x37e   :  { %v453_v53 = vpop.permute.xlu0 %452 }
 0x37f   :  { %v476_v21 = vsub.f32 %v1498_v5, %v453_v53 }
 0x380   :  { %v455_v60 = vpop.permute.xlu1 %454 }
 0x381   :  { %534 = vperm.xlu1 %1333, %v476_v21   ;;  %v477_v27 = vsub.f32 %v1510_v7, %v455_v60 }
 0x384   :  { %v457_v61 = vpop.permute.xlu1 %456 }
 0x385   :  { %v459_v22 = vpop.permute.xlu0 %458  ;;  %v478_v24 = vsub.f32 %v1503_v6, %v457_v61 }
 0x386   :  { %v479_v25 = vsub.f32 %v1515_v8, %v459_v22 }
 0x387   :  { %544 = vperm.xlu0 %1331, %v478_v24  }
 0x388   :  { %549 = vperm.xlu1 %1333, %v479_v25   ;;  %v461_v26 = vpop.permute.xlu1 %460 }
 0x389   :  { %v463_v29 = vpop.permute.xlu0 %462  ;;  %v480_v30 = vsub.f32 %v1523_v13, %v461_v26 }
 0x38a   :  { %v481_v36 = vsub.f32 %v1528_v14, %v463_v29 }
 0x38b   :  { %1332 = vset.pattern.permute.xlu0 %v1438_v4  ;;  %v1360_v4 = vld [vmem:[%s1852_s3 + $0x20] sm:$0xff]  }
 0x38c   :  { %539 = vperm.xlu1 %1333, %v477_v27   ;;  %516 = vperm.xlu0 %1332, %v434_v46   ;;  %v465_v28 = vpop.permute.xlu1 %464 }
 0x38d   :  { %v482_v32 = vsub.f32 %v1538_v16, %v465_v28  ;;  %v467_v38 = vpop.permute.xlu0 %466  ;;  %1282 = vmatprep.mubr.msk.bf16.mxu0 %vm261_vm1, %v1360_v4 }
 0x38e   :  { %v483_v40 = vsub.f32 %v1543_v17, %v467_v38 }
 0x390   :  { %554 = vperm.xlu1 %1333, %v480_v30   ;;  %1334 = vset.pattern.permute.xlu0 %v1440_v52 }
 0x391   :  { %564 = vperm.xlu0 %1334, %v482_v32  }
 0x394   :  { %559 = vperm.xlu1 %1333, %v481_v36  }
 0x395   :  { %1336 = vset.pattern.permute.xlu0 %v1441_v41 }
 0x396   :  { %597 = vperm.xlu0 %1336, %v1510_v7  }
 0x398   :  { %569 = vperm.xlu1 %1333, %v483_v40  }
 0x39a   :  { %609 = vperm.xlu0 %1336, %v1523_v13  }
 0x39c   :  { %1335 = vset.pattern.permute.xlu1 %v1441_v41 }
 0x39d   :  { %593 = vperm.xlu1 %1335, %v1498_v5   ;;  %v487_v43 = vpop.permute.xlu1 %486 }
 0x39e   :  { %617 = vperm.xlu0 %1336, %v1538_v16   ;;  %v492_v45 = vpop.permute.xlu0 %491  ;;  %v524_v57 = vmul.f32 %v487_v43, %v1579_v9 }
 0x39f   :  { %v525_v56 = vmul.f32 %v492_v45, %v1581_v15 }
 0x3a1   :  { %601 = vperm.xlu1 %1335, %v1503_v6   ;;  %v502_v44 = vpop.permute.xlu1 %501 }
 0x3a2   :  { %v497_v48 = vpop.permute.xlu0 %496  ;;  %v527_v59 = vmul.f32 %v502_v44, %v1584_v20 }
 0x3a3   :  { %v526_v58 = vmul.f32 %v497_v48, %v1587_v23 }
 0x3a5   :  { %605 = vperm.xlu1 %1335, %v1515_v8   ;;  %v507_v47 = vpop.permute.xlu1 %506 }
 0x3a6   :  { %v512_v51 = vpop.permute.xlu0 %511  ;;  %v528_v15 = vmul.f32 %v507_v47, %v1591_v31  ;;  %v1361_v31 = vld [vmem:[%s1852_s3 + $0x28] sm:$0xff]  }
 0x3a7   :  { %v529_v11 = vmul.f32 %v512_v51, %v1593_v33  ;;  %v1362_v33 = vld [vmem:[%s1852_s3 + $0x30] sm:$0xff]  }
 0x3a9   :  { %613 = vperm.xlu1 %1335, %v1528_v14   ;;  %v522_v49 = vpop.permute.xlu1 %521 }
 0x3aa   :  { %v531_v46 = vmul.f32 %v522_v49, %v1599_v35 }
 0x3ad   :  { %621 = vperm.xlu1 %1335, %v1543_v17  }
 0x400   :  { %v535_v50 = vpop.permute.xlu1 %534 }
 0x401   :  { %v572_v63 = vadd.f32 %v535_v50, %v524_v57 }
 0x406   :  { %v545_v55 = vpop.permute.xlu0 %544 }
 0x407   :  { %v550_v54 = vpop.permute.xlu1 %549  ;;  %v574_v37 = vadd.f32 %v545_v55, %v526_v58 }
 0x408   :  { %v575_v0 = vadd.f32 %v550_v54, %v527_v59 }
 0x40a   :  { %v589_v10 = vpack.c.bf16 %v575_v0, %v574_v37 }
 0x40b   :  { %v540_v62 = vpop.permute.xlu1 %539  ;;  %v517_v39 = vpop.permute.xlu0 %516 }
 0x40c   :  { %v573_v1 = vadd.f32 %v540_v62, %v525_v56  ;;  %v530_v42 = vmul.f32 %v517_v39, %v1597_v34  ;;  %v1363_v34 = vld [vmem:[%s1852_s3 + $0x38] sm:$0xff]  }
 0x40e   :  { %v588_v2 = vpack.c.bf16 %v573_v1, %v572_v63 }
 0x40f   :  { %v555_v3 = vpop.permute.xlu1 %554 }
 0x410   :  { %1274 = vmatprep.subr.bf16.mxu0 %v588_v2  ;;  %v576_v23 = vadd.f32 %v555_v3, %v528_v15  ;;  %v565_v20 = vpop.permute.xlu0 %564 }
 0x411   :  { %1275 = vmatpush3.bf16.msra.mxu0 %v588_v2  ;;  %v578_v52 = vadd.f32 %v565_v20, %v530_v42 }
 0x412   :  { %1276 = vmatprep.subr.bf16.mxu0 %v589_v10 }
 0x413   :  { %v560_v9 = vpop.permute.xlu1 %559 }
 0x414   :  { %v577_v12 = vadd.f32 %v560_v9, %v529_v11 }
 0x415   :  { %1277 = vmatpush3.bf16.msra.mxu0 %v589_v10  ;;  %v598_v61 = vpop.permute.xlu0 %597 }
 0x416   :  { %v590_v18 = vpack.c.bf16 %v577_v12, %v576_v23 }
 0x417   :  { %v570_v19 = vpop.permute.xlu1 %569 }
 0x418   :  { %v579_v53 = vadd.f32 %v570_v19, %v531_v46  ;;  %1278 = vmatprep.subr.bf16.mxu0 %v590_v18 }
 0x419   :  { %1279 = vmatpush3.bf16.msra.mxu0 %v590_v18  ;;  %v610_v36 = vpop.permute.xlu0 %609 }
 0x41a   :  { %v591_v21 = vpack.c.bf16 %v579_v53, %v578_v52 }
 0x41c   :  { %1280 = vmatprep.subr.bf16.mxu0 %v591_v21  ;;  %v594_v35 = vpop.permute.xlu1 %593 }
 0x41d   :  { %1281 = vmatpush3.bf16.msra.mxu0 %v591_v21  ;;  %v618_v48 = vpop.permute.xlu0 %617 }
 0x420   :  { %1283 = vmatmul.mubr.msk.bf16.vlgmr.msra.gmra.mrb[8].mxu0 %vm261_vm1, %v1361_v31  ;;  %v602_v60 = vpop.permute.xlu1 %601 }
 0x421   :  { %1286 = vmatprep.mubr.msk.bf16.mxu0 %vm261_vm1, %v1362_v33 }
 0x424   :  { %v606_v27 = vpop.permute.xlu1 %605 }
 0x428   :  { %1287 = vmatmul.mubr.msk.bf16.gmra.mrb[12].mxu0 %vm261_vm1, %v1363_v34  ;;  %v614_v43 = vpop.permute.xlu1 %613 }
 0x42c   :  { %v622_v56 = vpop.permute.xlu1 %621 }
 0x4f3   :  { %v1284_v22 = vpop.f32.mrb[8].mxu0 }
 0x4f4   :  { %v690_v24 = vpop.f32.mrb[9].mxu0  ;;  %v699_v29 = vadd.f32 %v1284_v22, %v602_v60 }
 0x4f5   :  { %v691_v25 = vadd.f32 %v690_v24, %v594_v35  ;;  %v1285_v26 = vpop.f32.mrb[10].mxu0 }
 0x4f6   :  { %v693_v28 = vpop.f32.mrb[11].mxu0  ;;  %v1707_v40 = vmax.f32 %v699_v29, 0.0  ;;  %v702_v4 = vadd.f32 %v1285_v26, %v606_v27 }
 0x4f7   :  { %v1702_v30 = vmax.f32 %v691_v25, 0.0  ;;  %v694_v32 = vadd.f32 %v693_v28, %v598_v61  ;;  %v1442_v28 = vmov 5  }
 0x4f8   :  { %v1711_v50 = vmax.f32 %v702_v4, 0.0  ;;  %1337 = vset.pattern.permute.xlu0 %v1442_v28  ;;  %1338 = vset.pattern.permute.xlu1 %v1442_v28 }
 0x4f9   :  { %v1704_v38 = vmax.f32 %v694_v32, 0.0  ;;  %729 = vadd.xlane.f32.xlu0 %v1702_v30 }
 0x4fb   :  { %v1288_v41 = vpop.f32.mrb[12].mxu0  ;;  %731 = vadd.xlane.f32.xlu1 %v1704_v38 }
 0x4fc   :  { %v706_v44 = vpop.f32.mrb[13].mxu0  ;;  %v715_v51 = vadd.f32 %v1288_v41, %v618_v48 }
 0x4fd   :  { %v707_v45 = vadd.f32 %v706_v44, %v610_v36  ;;  %v1289_v47 = vpop.f32.mrb[14].mxu0  ;;  %733 = vadd.xlane.f32.xlu0 %v1707_v40 }
 0x4fe   :  { %v709_v49 = vpop.f32.mrb[15].mxu0  ;;  %v1717_v57 = vmax.f32 %v715_v51, 0.0  ;;  %v718_v58 = vadd.f32 %v1289_v47, %v622_v56 }
 0x4ff   :  { %v1713_v54 = vmax.f32 %v707_v45, 0.0  ;;  %v710_v55 = vadd.f32 %v709_v49, %v614_v43 }
 0x500   :  { %v1723_v62 = vmax.f32 %v718_v58, 0.0 }
 0x501   :  { %737 = vadd.xlane.f32.xlu1 %v1713_v54  ;;  %735 = vadd.xlane.f32.xlu0 %v1711_v50  ;;  %v1719_v59 = vmax.f32 %v710_v55, 0.0 }
 0x505   :  { %741 = vadd.xlane.f32.xlu1 %v1717_v57  ;;  %739 = vadd.xlane.f32.xlu0 %v1719_v59 }
 0x509   :  { %743 = vadd.xlane.f32.xlu0 %v1723_v62 }
 0x586   :  { %v730_v63 = vpop.xlane.xlu0 %729 }
 0x587   :  { %v1726_v37 = vmul.f32 0.0078125, %v730_v63 }
 0x588   :  { %v732_v0 = vpop.xlane.xlu1 %731 }
 0x589   :  { %v1728_v1 = vmul.f32 0.0078125, %v732_v0  ;;  %v753_v2 = vsub.f32 %v1702_v30, %v1726_v37 }
 0x58a   :  { %v734_v39 = vpop.xlane.xlu0 %733 }
 0x58b   :  { %v1732_v3 = vmul.f32 0.0078125, %v734_v39  ;;  %v761_v10 = vmul.f32 %v753_v2, %v753_v2  ;;  %v754_v11 = vsub.f32 %v1704_v38, %v1728_v1 }
 0x58d   :  { %769 = vadd.xlane.f32.xlu1 %v761_v10  ;;  %v762_v15 = vmul.f32 %v754_v11, %v754_v11  ;;  %v755_v9 = vsub.f32 %v1707_v40, %v1732_v3 }
 0x58e   :  { %v736_v23 = vpop.xlane.xlu0 %735  ;;  %v738_v12 = vpop.xlane.xlu1 %737 }
 0x58f   :  { %v1738_v20 = vmul.f32 0.0078125, %v736_v23  ;;  %v1740_v46 = vmul.f32 0.0078125, %v738_v12  ;;  %771 = vadd.xlane.f32.xlu0 %v762_v15  ;;  %v763_v42 = vmul.f32 %v755_v9, %v755_v9 }
 0x591   :  { %773 = vadd.xlane.f32.xlu1 %v763_v42  ;;  %v756_v18 = vsub.f32 %v1711_v50, %v1738_v20  ;;  %v757_v19 = vsub.f32 %v1713_v54, %v1740_v46 }
 0x592   :  { %v740_v52 = vpop.xlane.xlu0 %739  ;;  %v742_v53 = vpop.xlane.xlu1 %741 }
 0x593   :  { %v1746_v21 = vmul.f32 0.0078125, %v740_v52  ;;  %v1748_v31 = vmul.f32 0.0078125, %v742_v53  ;;  %v764_v33 = vmul.f32 %v756_v18, %v756_v18  ;;  %v765_v34 = vmul.f32 %v757_v19, %v757_v19 }
 0x595   :  { %775 = vadd.xlane.f32.xlu0 %v764_v33  ;;  %777 = vadd.xlane.f32.xlu1 %v765_v34  ;;  %v758_v35 = vsub.f32 %v1719_v59, %v1746_v21  ;;  %v759_v60 = vsub.f32 %v1717_v57, %v1748_v31 }
 0x596   :  { %v744_v61 = vpop.xlane.xlu0 %743 }
 0x597   :  { %v1754_v22 = vmul.f32 0.0078125, %v744_v61  ;;  %v766_v24 = vmul.f32 %v758_v35, %v758_v35  ;;  %v767_v25 = vmul.f32 %v759_v60, %v759_v60 }
 0x599   :  { %779 = vadd.xlane.f32.xlu0 %v766_v24  ;;  %781 = vadd.xlane.f32.xlu1 %v767_v25  ;;  %v760_v26 = vsub.f32 %v1723_v62, %v1754_v22 }
 0x59b   :  { %v768_v27 = vmul.f32 %v760_v26, %v760_v26 }
 0x59d   :  { %783 = vadd.xlane.f32.xlu0 %v768_v27 }
 0x61a   :  { %v770_v29 = vpop.xlane.xlu1 %769 }
 0x61b   :  { %v785_v32 = vmul.f32 0.0078125, %v770_v29 }
 0x61c   :  { %v772_v36 = vpop.xlane.xlu0 %771 }
 0x61d   :  { %v793_v4 = vadd.f32 1e-05, %v785_v32  ;;  %v786_v41 = vmul.f32 0.0078125, %v772_v36  ;;  %v1406_v36 = vld [vmem:[%s1853_s4 + $0x10] sm:$0xff] }
 0x61e   :  { %v774_v43 = vpop.xlane.xlu1 %773 }
 0x61f   :  { %1384 = vrsqrt.f32 %v793_v4  ;;  %v794_v44 = vadd.f32 1e-05, %v786_v41  ;;  %v787_v45 = vmul.f32 0.0078125, %v774_v43 }
 0x621   :  { %1386 = vrsqrt.f32 %v794_v44  ;;  %v795_v47 = vadd.f32 1e-05, %v787_v45  ;;  %v1407_v44 = vld [vmem:[%s1853_s4 + $0x18] sm:$0xff] }
 0x622   :  { %v776_v48 = vpop.xlane.xlu0 %775  ;;  %v778_v49 = vpop.xlane.xlu1 %777 }
 0x623   :  { %1388 = vrsqrt.f32 %v795_v47  ;;  %v788_v51 = vmul.f32 0.0078125, %v776_v48  ;;  %v789_v55 = vmul.f32 0.0078125, %v778_v49  ;;  %v1408_v48 = vld [vmem:[%s1853_s4 + $0x28] sm:$0xff] }
 0x625   :  { %v796_v56 = vadd.f32 1e-05, %v788_v51  ;;  %v797_v58 = vadd.f32 1e-05, %v789_v55 }
 0x626   :  { %v780_v63 = vpop.xlane.xlu0 %779  ;;  %v782_v0 = vpop.xlane.xlu1 %781 }
 0x627   :  { %1390 = vrsqrt.f32 %v796_v56  ;;  %v790_v2 = vmul.f32 0.0078125, %v780_v63  ;;  %v791_v39 = vmul.f32 0.0078125, %v782_v0  ;;  %v1409_v56 = vld [vmem:[%s1853_s4 + $0x20] sm:$0xff]  ;;  %v1410_v0 = vld [vmem:[%s1853_s4 + $0x38] sm:$0xff] }
 0x628   :  { %1392 = vrsqrt.f32 %v797_v58 }
 0x629   :  { %v1385_v10 = vpop.eup %1384  ;;  %v798_v11 = vadd.f32 1e-05, %v790_v2  ;;  %v799_v15 = vadd.f32 1e-05, %v791_v39  ;;  %v1365_v2 = vld [vmem:[%s1852_s3 + $0x50] sm:$0xff]   ;;  %v1444_v39 = vmov 7  }
 0x62a   :  { %v784_v9 = vpop.xlane.xlu0 %783  ;;  %v809_v23 = vmul.f32 %v1385_v10, %v1498_v5  ;;  %1302 = vmatprep.mubr.msk.bf16.mxu1 %vm261_vm1, %v1365_v2  ;;  %v1445_v10 = vmov 8  }
 0x62b   :  { %v1387_v12 = vpop.eup %1386  ;;  %1394 = vrsqrt.f32 %v798_v11  ;;  %v792_v42 = vmul.f32 0.0078125, %v784_v9  ;;  %v1411_v11 = vld [vmem:[%s1853_s4 + $0x30] sm:$0xff] }
 0x62c   :  { %1396 = vrsqrt.f32 %v799_v15  ;;  %v817_v18 = vmul.f32 %v809_v23, %v1726_v37  ;;  %v810_v19 = vmul.f32 %v1387_v12, %v1510_v7 }
 0x62d   :  { %v1389_v52 = vpop.eup %1388  ;;  %v800_v53 = vadd.f32 1e-05, %v792_v42 }
 0x62e   :  { %833 = vrot.lane.b32.xlu1 %v817_v18, %s1439_s1  ;;  %v818_v33 = vmul.f32 %v810_v19, %v1728_v1  ;;  %v811_v34 = vmul.f32 %v1389_v52, %v1503_v6 }
 0x62f   :  { %1398 = vrsqrt.f32 %v800_v53 }
 0x630   :  { %835 = vrot.lane.b32.xlu0 %v818_v33, %s1439_s1  ;;  %v819_v5 = vmul.f32 %v811_v34, %v1732_v3 }
 0x631   :  { %v1391_v35 = vpop.eup %1390 }
 0x632   :  { %v1393_v60 = vpop.eup %1392  ;;  %837 = vrot.lane.b32.xlu1 %v819_v5, %s1439_s1  ;;  %v812_v37 = vmul.f32 %v1391_v35, %v1515_v8 }
 0x633   :  { %v813_v7 = vmul.f32 %v1393_v60, %v1523_v13 }
 0x634   :  { %v820_v61 = vmul.f32 %v812_v37, %v1738_v20 }
 0x635   :  { %v1395_v24 = vpop.eup %1394  ;;  %v821_v1 = vmul.f32 %v813_v7, %v1740_v46 }
 0x636   :  { %v1397_v25 = vpop.eup %1396  ;;  %839 = vrot.lane.b32.xlu1 %v820_v61, %s1439_s1  ;;  %v814_v6 = vmul.f32 %v1395_v24, %v1528_v14  ;;  %v1443_v14 = vmov 6  }
 0x637   :  { %841 = vrot.lane.b32.xlu0 %v821_v1, %s1439_s1  ;;  %v815_v3 = vmul.f32 %v1397_v25, %v1538_v16 }
 0x638   :  { %v822_v26 = vmul.f32 %v814_v6, %v1746_v21  ;;  %v1404_v21 = vld [vmem:[%s1853_s4] sm:$0xff] }
 0x639   :  { %v1399_v27 = vpop.eup %1398  ;;  %v823_v8 = vmul.f32 %v815_v3, %v1748_v31 }
 0x63a   :  { %843 = vrot.lane.b32.xlu1 %v822_v26, %s1439_s1  ;;  %v816_v13 = vmul.f32 %v1399_v27, %v1543_v17 }
 0x63b   :  { %845 = vrot.lane.b32.xlu0 %v823_v8, %s1439_s1 }
 0x63c   :  { %v824_v20 = vmul.f32 %v816_v13, %v1754_v22  ;;  %v1405_v22 = vld [vmem:[%s1853_s4 + $0x8] sm:$0xff] }
 0x63e   :  { %847 = vrot.lane.b32.xlu1 %v824_v20, %s1439_s1 }
 0x63f   :  { %867 = vperm.xlu0 %1337, %v809_v23  }
 0x642   :  { %872 = vperm.xlu1 %1338, %v810_v19  }
 0x643   :  { %887 = vperm.xlu0 %1337, %v813_v7  }
 0x646   :  { %877 = vperm.xlu1 %1338, %v811_v34  }
 0x647   :  { %1340 = vset.pattern.permute.xlu0 %v1443_v14 }
 0x64a   :  { %882 = vperm.xlu1 %1338, %v812_v37  }
 0x64e   :  { %1339 = vset.pattern.permute.xlu1 %v1443_v14 }
 0x6a0   :  { %v834_v46 = vpop.permute.xlu1 %833 }
 0x6a1   :  { %v857_v17 = vsub.f32 %v1404_v21, %v834_v46 }
 0x6a2   :  { %v836_v31 = vpop.permute.xlu0 %835 }
 0x6a3   :  { %v858_v29 = vsub.f32 %v1405_v22, %v836_v31  ;;  %915 = vperm.xlu1 %1339, %v857_v17  }
 0x6a4   :  { %v838_v32 = vpop.permute.xlu1 %837 }
 0x6a5   :  { %920 = vperm.xlu0 %1340, %v858_v29   ;;  %v859_v4 = vsub.f32 %v1406_v36, %v838_v32 }
 0x6a8   :  { %v840_v41 = vpop.permute.xlu1 %839 }
 0x6a9   :  { %v842_v43 = vpop.permute.xlu0 %841  ;;  %v860_v45 = vsub.f32 %v1407_v44, %v840_v41  ;;  %925 = vperm.xlu0 %1340, %v859_v4  }
 0x6aa   :  { %v861_v58 = vsub.f32 %v1409_v56, %v842_v43 }
 0x6ab   :  { %930 = vperm.xlu1 %1339, %v860_v45  }
 0x6ac   :  { %v844_v47 = vpop.permute.xlu1 %843 }
 0x6ad   :  { %v862_v49 = vsub.f32 %v1408_v48, %v844_v47  ;;  %v846_v51 = vpop.permute.xlu0 %845 }
 0x6ae   :  { %v863_v55 = vsub.f32 %v1538_v16, %v846_v51  ;;  %v1364_v16 = vld [vmem:[%s1852_s3 + $0x40] sm:$0xff]  }
 0x6af   :  { %1341 = vset.pattern.permute.xlu1 %v1442_v28  ;;  %940 = vperm.xlu0 %1340, %v862_v49  }
 0x6b0   :  { %892 = vperm.xlu1 %1341, %v814_v6   ;;  %v848_v63 = vpop.permute.xlu1 %847  ;;  %1298 = vmatprep.mubr.msk.bf16.mxu0 %vm261_vm1, %v1364_v16 }
 0x6b1   :  { %v864_v28 = vsub.f32 %v1410_v0, %v848_v63 }
 0x6b3   :  { %945 = vperm.xlu0 %1340, %v863_v55  }
 0x6b4   :  { %897 = vperm.xlu1 %1341, %v815_v3  }
 0x6b7   :  { %1345 = vset.pattern.permute.xlu0 %v1445_v10 }
 0x6b8   :  { %902 = vperm.xlu1 %1341, %v816_v13   ;;  %1115 = vperm.xlu0 %1345, %v1405_v22  }
 0x6bc   :  { %1342 = vset.pattern.permute.xlu1 %v1443_v14  ;;  %1346 = vset.pattern.permute.xlu0 %v1444_v39 }
 0x6bd   :  { %935 = vperm.xlu1 %1342, %v861_v58   ;;  %974 = vperm.xlu0 %1346, %v1404_v21  }
 0x6be   :  { %v868_v23 = vpop.permute.xlu0 %867 }
 0x6bf   :  { %v905_v19 = vmul.f32 %v868_v23, %v1702_v30 }
 0x6c1   :  { %950 = vperm.xlu1 %1342, %v864_v28   ;;  %986 = vperm.xlu0 %1346, %v1407_v44   ;;  %v873_v15 = vpop.permute.xlu1 %872 }
 0x6c2   :  { %v888_v42 = vpop.permute.xlu0 %887  ;;  %v906_v52 = vmul.f32 %v873_v15, %v1704_v38 }
 0x6c5   :  { %1343 = vset.pattern.permute.xlu1 %v1444_v39  ;;  %994 = vperm.xlu0 %1346, %v1408_v48   ;;  %v878_v9 = vpop.permute.xlu1 %877 }
 0x6c6   :  { %978 = vperm.xlu1 %1343, %v1405_v22   ;;  %v907_v60 = vmul.f32 %v878_v9, %v1707_v40 }
 0x6c9   :  { %1350 = vset.pattern.permute.xlu0 %v1445_v10  ;;  %v883_v12 = vpop.permute.xlu1 %882 }
 0x6ca   :  { %982 = vperm.xlu1 %1343, %v1406_v36   ;;  %1127 = vperm.xlu0 %1350, %v1409_v56   ;;  %v908_v37 = vmul.f32 %v883_v12, %v1711_v50  ;;  %v909_v50 = vmul.f32 %v888_v42, %v1713_v54  ;;  %v1366_v54 = vld [vmem:[%s1852_s3 + $0x48] sm:$0xff]  }
 0x6ce   :  { %1344 = vset.pattern.permute.xlu1 %v1445_v10  ;;  %1135 = vperm.xlu0 %1350, %v1411_v11  }
 0x6cf   :  { %1111 = vperm.xlu1 %1344, %v1404_v21  }
 0x6d3   :  { %1347 = vset.pattern.permute.xlu1 %v1444_v39 }
 0x6d4   :  { %990 = vperm.xlu1 %1347, %v1409_v56  }
 0x6d8   :  { %1348 = vset.pattern.permute.xlu1 %v1445_v10 }
 0x6d9   :  { %1119 = vperm.xlu1 %1348, %v1406_v36  }
 0x6dd   :  { %1123 = vperm.xlu1 %1348, %v1407_v44  }
 0x6e1   :  { %1349 = vset.pattern.permute.xlu1 %v1444_v39 }
 0x6e2   :  { %998 = vperm.xlu1 %1349, %v1411_v11  }
 0x6e6   :  { %1002 = vperm.xlu1 %1349, %v1410_v0  }
 0x6ea   :  { %1351 = vset.pattern.permute.xlu1 %v1445_v10 }
 0x6eb   :  { %1131 = vperm.xlu1 %1351, %v1408_v48  }
 0x6ef   :  { %1139 = vperm.xlu1 %1351, %v1410_v0  }
 0x722   :  { %v916_v18 = vpop.permute.xlu1 %915 }
 0x723   :  { %v953_v33 = vadd.f32 %v916_v18, %v905_v19 }
 0x724   :  { %v921_v53 = vpop.permute.xlu0 %920 }
 0x725   :  { %v954_v34 = vadd.f32 %v921_v53, %v906_v52 }
 0x727   :  { %v969_v5 = vpack.c.bf16 %v954_v34, %v953_v33 }
 0x728   :  { %v926_v35 = vpop.permute.xlu0 %925 }
 0x729   :  { %1290 = vmatprep.subr.bf16.mxu0 %v969_v5  ;;  %1306 = vmatprep.subr.bf16.mxu1 %v969_v5  ;;  %v955_v61 = vadd.f32 %v926_v35, %v907_v60 }
 0x72a   :  { %1291 = vmatpush3.bf16.msra.mxu0 %v969_v5  ;;  %1310 = vmatpush3.bf16.msra.mxu1 %v969_v5  ;;  %v931_v7 = vpop.permute.xlu1 %930 }
 0x72b   :  { %v956_v24 = vadd.f32 %v931_v7, %v908_v37 }
 0x72d   :  { %v970_v1 = vpack.c.bf16 %v956_v24, %v955_v61 }
 0x72e   :  { %v941_v40 = vpop.permute.xlu0 %940 }
 0x72f   :  { %1292 = vmatprep.subr.bf16.mxu0 %v970_v1  ;;  %1307 = vmatprep.subr.bf16.mxu1 %v970_v1  ;;  %v893_v30 = vpop.permute.xlu1 %892 }
 0x730   :  { %1293 = vmatpush3.bf16.msra.mxu0 %v970_v1  ;;  %1311 = vmatpush3.bf16.msra.mxu1 %v970_v1  ;;  %v910_v6 = vmul.f32 %v893_v30, %v1719_v59 }
 0x732   :  { %v958_v26 = vadd.f32 %v941_v40, %v910_v6  ;;  %v946_v14 = vpop.permute.xlu0 %945 }
 0x733   :  { %v898_v38 = vpop.permute.xlu1 %897 }
 0x734   :  { %v911_v27 = vmul.f32 %v898_v38, %v1717_v57  ;;  %v1367_v57 = vld [vmem:[%s1852_s3 + $0x58] sm:$0xff]  }
 0x736   :  { %v959_v21 = vadd.f32 %v946_v14, %v911_v27 }
 0x737   :  { %v903_v25 = vpop.permute.xlu1 %902  ;;  %v1116_v32 = vpop.permute.xlu0 %1115 }
 0x738   :  { %v912_v13 = vmul.f32 %v903_v25, %v1723_v62 }
 0x73c   :  { %v936_v3 = vpop.permute.xlu1 %935  ;;  %v975_v4 = vpop.permute.xlu0 %974 }
 0x73d   :  { %v957_v8 = vadd.f32 %v936_v3, %v909_v50 }
 0x73f   :  { %v971_v20 = vpack.c.bf16 %v958_v26, %v957_v8 }
 0x740   :  { %v951_v46 = vpop.permute.xlu1 %950  ;;  %v987_v43 = vpop.permute.xlu0 %986 }
 0x741   :  { %v960_v17 = vadd.f32 %v951_v46, %v912_v13  ;;  %1294 = vmatprep.subr.bf16.mxu0 %v971_v20  ;;  %1308 = vmatprep.subr.bf16.mxu1 %v971_v20 }
 0x742   :  { %1295 = vmatpush3.bf16.msra.mxu0 %v971_v20  ;;  %1312 = vmatpush3.bf16.msra.mxu1 %v971_v20 }
 0x743   :  { %v972_v59 = vpack.c.bf16 %v960_v17, %v959_v21  ;;  %v1164_v17 = vstv %s1854_s5 }
 0x744   :  { %v995_v45 = vpop.permute.xlu0 %994 }
 0x745   :  { %1296 = vmatprep.subr.bf16.mxu0 %v972_v59  ;;  %1309 = vmatprep.subr.bf16.mxu1 %v972_v59  ;;  %v979_v62 = vpop.permute.xlu1 %978 }
 0x746   :  { %1297 = vmatpush3.bf16.msra.mxu0 %v972_v59  ;;  %1313 = vmatpush3.bf16.msra.mxu1 %v972_v59 }
 0x749   :  { %1299 = vmatmul.mubr.msk.bf16.vlgmr.msra.gmra.mrb[16].mxu0 %vm261_vm1, %v1366_v54  ;;  %1303 = vmatmul.mubr.msk.bf16.vlgmr.msra.gmra.mrb[8].mxu1 %vm261_vm1, %v1367_v57  ;;  %v983_v31 = vpop.permute.xlu1 %982  ;;  %v1128_v19 = vpop.permute.xlu0 %1127 }
 0x74d   :  { %v1136_v30 = vpop.permute.xlu0 %1135 }
 0x74e   :  { %v1112_v22 = vpop.permute.xlu1 %1111 }
 0x753   :  { %v991_v29 = vpop.permute.xlu1 %990 }
 0x758   :  { %v1120_v36 = vpop.permute.xlu1 %1119 }
 0x75c   :  { %v1124_v41 = vpop.permute.xlu1 %1123 }
 0x761   :  { %v999_v44 = vpop.permute.xlu1 %998 }
 0x765   :  { %v1003_v10 = vpop.permute.xlu1 %1002 }
 0x76a   :  { %v1132_v5 = vpop.permute.xlu1 %1131 }
 0x76e   :  { %v1140_v40 = vpop.permute.xlu1 %1139 }
 0x81c   :  { %v1300_v47 = vpop.f32.mrb[16].mxu0  ;;  %v1304_v48 = vpop.f32.mrb[8].mxu1 }
 0x81d   :  { %v1071_v49 = vpop.f32.mrb[17].mxu0  ;;  %v1087_v51 = vpop.f32.mrb[9].mxu1  ;;  %v1080_v55 = vadd.f32 %v1300_v47, %v983_v31  ;;  %v1096_v53 = vadd.f32 %v1304_v48, %v999_v44 }
 0x81e   :  { %v1072_v56 = vadd.f32 %v1071_v49, %v975_v4  ;;  %v1301_v58 = vpop.f32.mrb[18].mxu0  ;;  %v1305_v63 = vpop.f32.mrb[10].mxu1  ;;  %v1088_v15 = vadd.f32 %v1087_v51, %v991_v29 }
 0x81f   :  { %v1074_v0 = vpop.f32.mrb[19].mxu0  ;;  %v1090_v28 = vpop.f32.mrb[11].mxu1  ;;  %v1083_v2 = vadd.f32 %v1301_v58, %v987_v43  ;;  %v1104_v11 = vmax.f32 %v1080_v55, 0.0  ;;  %v1099_v37 = vadd.f32 %v1305_v63, %v1003_v10  ;;  %v1108_v61 = vmax.f32 %v1096_v53, 0.0 }
 0x820   :  { %v1102_v16 = vmax.f32 %v1072_v56, 0.0  ;;  %v1075_v39 = vadd.f32 %v1074_v0, %v979_v62  ;;  %v1091_v18 = vadd.f32 %v1090_v28, %v995_v45  ;;  %v1106_v33 = vmax.f32 %v1088_v15, 0.0 }
 0x821   :  { %v1105_v12 = vmax.f32 %v1083_v2, 0.0  ;;  %v1144_v52 = vmul.f32 %v1120_v36, %v1104_v11  ;;  %v1109_v38 = vmax.f32 %v1099_v37, 0.0  ;;  %v1148_v3 = vmul.f32 %v1136_v30, %v1108_v61 }
 0x822   :  { %v1103_v9 = vmax.f32 %v1075_v39, 0.0  ;;  %v1142_v23 = vmul.f32 %v1112_v22, %v1102_v16  ;;  %v1107_v60 = vmax.f32 %v1091_v18, 0.0  ;;  %v1146_v24 = vmul.f32 %v1128_v19, %v1106_v33 }
 0x823   :  { %v1145_v35 = vmul.f32 %v1124_v41, %v1105_v12  ;;  %v1149_v27 = vmul.f32 %v1140_v40, %v1109_v38 }
 0x824   :  { %v1143_v42 = vmul.f32 %v1116_v32, %v1103_v9  ;;  %v1147_v6 = vmul.f32 %v1132_v5, %v1107_v60 }
 0x826   :  { %v1150_v34 = vadd.f32 %v1143_v42, %v1142_v23 }
 0x828   :  { %v1151_v7 = vadd.f32 %v1150_v34, %v1144_v52 }
 0x82a   :  { %v1152_v1 = vadd.f32 %v1151_v7, %v1145_v35 }
 0x82c   :  { %v1153_v25 = vadd.f32 %v1152_v1, %v1146_v24 }
 0x82e   :  { %v1154_v50 = vadd.f32 %v1153_v25, %v1147_v6 }
 0x830   :  { %v1155_v26 = vadd.f32 %v1154_v50, %v1148_v3 }
 0x832   :  { %v1156_v8 = vadd.f32 %v1155_v26, %v1149_v27 }
 0x834   :  { %v1157_v13 = vrot.slane %v1156_v8, 4 }
 0x836   :  { %v1158_v20 = vadd.f32 %v1157_v13, %v1156_v8 }
 0x838   :  { %v1159_v14 = vrot.slane %v1158_v20, 2 }
 0x83a   :  { %v1160_v46 = vadd.f32 %v1159_v14, %v1158_v20 }
 0x83c   :  { %v1161_v21 = vrot.slane %v1160_v46, 1 }
 0x83e   :  { %v1162_v59 = vadd.f32 %v1161_v21, %v1160_v46 }
 0x840   :  { %v1165_v54 = vadd.f32 %v1164_v17, %v1162_v59 }
 0x842   :  { %v1166_v57 = vsub.f32 0.0, %v1165_v54 }
 0x844   :  { %v1167_v62 = vmul.f32 1.442695, %v1166_v57 }
 0x846   :  { %1400 = vpow2.f32 %v1167_v62 }
 0x850   :  { %v1401_v31 = vpop.eup %1400 }
 0x851   :  { %v1169_v22 = vadd.f32 1.0, %v1401_v31 }
 0x853   :  { %1402 = vrcp.f32 %v1169_v22 }
 0x85d   :  { %v1403_v29 = vpop.eup %1402 }
 0x85e   :  { %1172 = vst [vmem:[#allocation4] sm:$0x1] %v1403_v29 }
 0x85f   :  { %1423 = shalt.err (!%p1420_p4)
}
 0x860   :  { %s1424_s17 = scalar_lea.hbm %s1855_s6, 16 }
 0x861   :  { %p1425_p5 = scmp.ne.s32.totalorder %s1855_s6, %s1424_s17  ;;  %p1428_p6 = scmp.lt.u32.totalorder %s1424_s17, %s1855_s6 }
 0x863   :  { %p1430_p7 = pnand %p1428_p6, %p1425_p5 }
 0x865   :  { %1433 = shalt.err (!%p1430_p7)
}
 0x866   :  { %1182 = dma.vmem_to_hbm [thread:$0]  %s1180_s13, 16, %s1855_s6, [#allocation5]  }
 0x867   :  { %1434 = dma.done.wait [#allocation5], 16  }
 0x868   :  { %1435 = vsyncadd [#allocation5], 4294967280 }
 0x869   :  { %1186 = vsyncpa [#allocation5], 1 }

</bundles_post_ra>
